<compile_context>
chip_gen: v7x
topology: tpu7x:2x2x1
jax: 0.10.0
libtpu: 0.0.40
codegen_flags: <defaults>
</compile_context>

<pallas_src>
import functools

import jax
import jax.numpy as jnp
from jax.experimental import pallas as pl
from jax.experimental.pallas import tpu as pltpu


# ------------------------- in-kernel math helpers ---------------------------

def _erf(x, approx_recip=False):
    # Abramowitz & Stegun 7.1.26 polynomial erf, max abs error ~1.5e-7.
    a1, a2, a3, a4, a5 = (0.254829592, -0.284496736, 1.421413741,
                          -1.453152027, 1.061405429)
    p = 0.3275911
    s = jnp.where(x >= 0.0, 1.0, -1.0)
    ax = jnp.abs(x)
    denom = 1.0 + p * ax
    if approx_recip:
        # EUP reciprocal (free slot); only used on the loose-tolerance bf16 path.
        t = pl.reciprocal(denom, approx=True)
    else:
        t = 1.0 / denom
    poly = ((((a5 * t + a4) * t + a3) * t + a2) * t + a1) * t
    return s * (1.0 - poly * jnp.exp(-ax * ax))


def _gelu_exact(x, approx_recip=False):
    # PyTorch nn.GELU() default (erf form): 0.5 * x * (1 + erf(x / sqrt(2)))
    return 0.5 * x * (1.0 + _erf(x * 0.7071067811865476, approx_recip))


def _round_up(x, m):
    return ((x + m - 1) // m) * m


# ------------------------------- Pallas kernel ------------------------------

def gcn_kernel(a_ref, x_ref, w1_ref, b1_ref, pa_ref, w2fc_ref,
               out_ref, acc_ref, *, approx_recip=False):
    """Grid = (row tiles i of A_hat, contraction tiles k).

    a_ref    : (TM, TK)      tile of A_hat
    x_ref    : (TK, Cin_p)   tile of node features
    w1_ref   : (Cin_p, Hp)   conv1 weight (VMEM-resident)
    b1_ref   : (1, Hp)       conv1 bias, f32
    pa_ref   : (Gp, TM)      columns of P@A_hat for this row tile
    w2fc_ref : (Hp, Cp)      folded W2@Wfc (VMEM-resident)
    out_ref  : (Gp, Cp)      per-row-tile partial of the pooled output
    acc_ref  : (TM, Hp) f32  accumulator for A_hat @ (X @ W1)
    """
    k = pl.program_id(1)
    nk = pl.num_programs(1)

    @pl.when(k == 0)
    def _():
        acc_ref[...] = jnp.zeros_like(acc_ref)

    # conv1 pre-projection for this K tile (hidden under the A_hat DMA, which
    # dominates HBM traffic), then propagate with the A_hat tile on the MXU.
    xw = jnp.dot(x_ref[...], w1_ref[...], preferred_element_type=jnp.float32)
    acc_ref[...] += jnp.dot(a_ref[...], xw.astype(a_ref.dtype),
                            preferred_element_type=jnp.float32)

    @pl.when(k == nk - 1)
    def _():
        # GELU in f32 on the accumulator (exact / erf form, matches nn.GELU()).
        h = _gelu_exact(acc_ref[...] + b1_ref[...], approx_recip)
        # Folded tail:  (P@A_hat)[:, row_tile] @ H_tile @ (W2@Wfc)
        ph = jnp.dot(pa_ref[...], h.astype(pa_ref.dtype),
                     preferred_element_type=jnp.float32)
        out_ref[...] = jnp.dot(ph.astype(w2fc_ref.dtype), w2fc_ref[...],
                               preferred_element_type=jnp.float32)


# --------------------------------- wrapper ----------------------------------

def build_gcn_operators(edge_index, batch, num_nodes, num_graphs):
    """Glue (plain JAX): dense normalized adjacency + mean-pool matrix."""
    src, dst = edge_index[0], edge_index[1]
    A = jnp.zeros((num_nodes, num_nodes), jnp.float32).at[dst, src].add(1.0)
    A = A + jnp.eye(num_nodes, dtype=jnp.float32)             # self loops
    deg = A.sum(axis=1)
    dinv = jax.lax.rsqrt(deg)
    A_hat = dinv[:, None] * A * dinv[None, :]                  # D^-1/2 (A+I) D^-1/2

    counts = jnp.zeros((num_graphs,), jnp.float32).at[batch].add(1.0)
    P = jax.nn.one_hot(batch, num_graphs, dtype=jnp.float32).T
    P = P / jnp.maximum(counts, 1.0)[:, None]                  # [G, N]
    return A_hat, P


@functools.partial(jax.jit,
                   static_argnums=(4,),
                   static_argnames=("compute_dtype", "tile"))
def gcn_forward(x, edge_index, batch, params, num_graphs, *,
                compute_dtype=jnp.bfloat16, tile=512):
    w1, b1, w2, b2, wfc, bfc = params
    N, cin = x.shape
    hidden = w1.shape[1]
    ncls = wfc.shape[1]

    A_hat, P = build_gcn_operators(edge_index, batch, N, num_graphs)

    # --- algebraic folding of the post-GELU tail (tiny precomputes, f32) ----
    PA = P @ A_hat                          # [G, N]
    W2fc = w2 @ wfc                         # [hidden, ncls]
    tail_bias = b2 @ wfc + bfc              # [ncls]

    # --- padded, lane-dense layouts ------------------------------------------
    LANE, SUB = 128, 8
    TM = min(tile, _round_up(N, LANE))
    Np = _round_up(N, TM)
    TK = TM
    Cin_p = _round_up(cin, LANE)
    Hp = _round_up(hidden, LANE)
    Cp = _round_up(ncls, LANE)
    Gp = _round_up(num_graphs, SUB)

    cd = compute_dtype
    A_p = jnp.zeros((Np, Np), jnp.float32).at[:N, :N].set(A_hat).astype(cd)
    X_p = jnp.zeros((Np, Cin_p), jnp.float32).at[:N, :cin].set(x).astype(cd)
    W1_p = jnp.zeros((Cin_p, Hp), jnp.float32).at[:cin, :hidden].set(w1).astype(cd)
    b1_p = jnp.zeros((1, Hp), jnp.float32).at[0, :hidden].set(b1)
    PA_p = jnp.zeros((Gp, Np), jnp.float32).at[:num_graphs, :N].set(PA).astype(cd)
    W2fc_p = jnp.zeros((Hp, Cp), jnp.float32).at[:hidden, :ncls].set(W2fc).astype(cd)

    ni, nk = Np // TM, Np // TK

    kernel = functools.partial(gcn_kernel,
                               approx_recip=(cd == jnp.bfloat16))

    out_partial = pl.pallas_call(
        kernel,
        out_shape=jax.ShapeDtypeStruct((ni, Gp, Cp), jnp.float32),
        grid_spec=pltpu.PrefetchScalarGridSpec(
            num_scalar_prefetch=0,
            grid=(ni, nk),
            in_specs=[
                pl.BlockSpec((TM, TK), lambda i, k: (i, k)),        # A_hat tile
                pl.BlockSpec((TK, Cin_p), lambda i, k: (k, 0)),     # X tile
                pl.BlockSpec((Cin_p, Hp), lambda i, k: (0, 0)),     # W1
                pl.BlockSpec((1, Hp), lambda i, k: (0, 0)),         # b1
                pl.BlockSpec((Gp, TM), lambda i, k: (0, i)),        # P@A_hat cols
                pl.BlockSpec((Hp, Cp), lambda i, k: (0, 0)),        # W2@Wfc
            ],
            out_specs=pl.BlockSpec((None, Gp, Cp), lambda i, k: (i, 0, 0)),
            scratch_shapes=[pltpu.VMEM((TM, Hp), jnp.float32)],
        ),
        compiler_params=pltpu.CompilerParams(
            dimension_semantics=("parallel", "arbitrary")),
    )(A_p, X_p, W1_p, b1_p, PA_p, W2fc_p)

    # Tiny finalize in JAX: sum row-tile partials, strip padding, add folded bias.
    out = out_partial.sum(axis=0)[:num_graphs, :ncls] + tail_bias[None, :]
    return out


# ------------------------------ pure-JAX reference --------------------------

def gcn_reference(x, edge_index, batch, params, num_graphs):
    w1, b1, w2, b2, wfc, bfc = params
    A_hat, P = build_gcn_operators(edge_index, batch, x.shape[0], num_graphs)
    h = A_hat @ (x @ w1) + b1
    h = 0.5 * h * (1.0 + jax.scipy.special.erf(h / jnp.sqrt(2.0)))  # exact GELU
    h = A_hat @ (h @ w2) + b2
    pooled = P @ h
    return pooled @ wfc + bfc


# ----------------------------------- main ------------------------------------

if __name__ == "__main__":
    in_channels, hidden_channels, out_channels, num_classes = 8, 32, 16, 4
    num_graphs, nodes_per_graph = 2, 8
    N = num_graphs * nodes_per_graph

    key = jax.random.PRNGKey(0)
    kx, k1, k2, k3, k4, k5, k6 = jax.random.split(key, 7)

    # node features
    x = jax.random.normal(kx, (N, in_channels), dtype=jnp.float32)

    # deterministic ring graph per sub-graph (bidirectional edges), PyG-style
    edges = []
    for g in range(num_graphs):
        off = g * nodes_per_graph
        for i in range(nodes_per_graph):
            j = (i + 1) % nodes_per_graph
            edges.append((off + i, off + j))
            edges.append((off + j, off + i))
    edge_index = jnp.array(edges, dtype=jnp.int32).T
    batch = jnp.repeat(jnp.arange(num_graphs, dtype=jnp.int32), nodes_per_graph)

    # deterministic parameter init (glorot-ish scaling)
    def dense_init(k, fan_in, fan_out):
        return jax.random.normal(k, (fan_in, fan_out), jnp.float32) / jnp.sqrt(fan_in)

    w1 = dense_init(k1, in_channels, hidden_channels)
    b1 = 0.01 * jax.random.normal(k2, (hidden_channels,), jnp.float32)
    w2 = dense_init(k3, hidden_channels, out_channels)
    b2 = 0.01 * jax.random.normal(k4, (out_channels,), jnp.float32)
    wfc = dense_init(k5, out_channels, num_classes)
    bfc = 0.01 * jax.random.normal(k6, (num_classes,), jnp.float32)
    params = (w1, b1, w2, b2, wfc, bfc)

    ref = jax.block_until_ready(
        gcn_reference(x, edge_index, batch, params, num_graphs))

    # f32 path: tight check of the tiled/folded kernel against the reference.
    out32 = gcn_forward(x, edge_index, batch, params, num_graphs,
                        compute_dtype=jnp.float32)
    out32 = jax.block_until_ready(out32)
    assert out32.shape == (num_graphs, num_classes)
    assert jnp.allclose(out32, ref, atol=1e-4, rtol=1e-4), (out32, ref)

    # bf16 MXU-operand path (f32 accumulation): loose check.
    out16 = gcn_forward(x, edge_index, batch, params, num_graphs,
                        compute_dtype=jnp.bfloat16)
    out16 = jax.block_until_ready(out16)
    assert out16.shape == (num_graphs, num_classes)
    assert jnp.allclose(out16, ref, atol=7e-2, rtol=7e-2), (out16, ref)

    print("KERNEL_OK")
</pallas_src>

<mosaic_0001>
module attributes {stable_mosaic.version = 11 : i64} {
  func.func private @main(%arg0: i32) attributes {dimension_semantics = [#tpu.dimension_semantics<core_parallel>], iteration_bounds = array<i64: 2>, tpu.core_type = #tpu.core_type<sc_scalar_subcore>, window_params = []} {
    return
  }
}

module attributes {stable_mosaic.version = 11 : i64} {
  func.func private @main(%arg0: i32) attributes {dimension_semantics = [#tpu.dimension_semantics<core_parallel>], iteration_bounds = array<i64: 2>, tpu.core_type = #tpu.core_type<sc_scalar_subcore>, window_params = []} {
    return
  }
}

module attributes {stable_mosaic.version = 11 : i64} {
  func.func @gcn_kernel(%arg0: i32, %arg1: i32, %arg2: memref<128x128xf32, #tpu.memory_space<vmem>>, %arg3: memref<128x128xf32, #tpu.memory_space<vmem>>, %arg4: memref<128x128xf32, #tpu.memory_space<vmem>>, %arg5: memref<1x128xf32, #tpu.memory_space<vmem>>, %arg6: memref<8x128xf32, #tpu.memory_space<vmem>>, %arg7: memref<128x128xf32, #tpu.memory_space<vmem>>, %arg8: memref<1x8x128xf32, #tpu.memory_space<vmem>>, %arg9: memref<128x128xf32, #tpu.memory_space<vmem>>) attributes {dimension_semantics = [#tpu.dimension_semantics<parallel>, #tpu.dimension_semantics<arbitrary>], iteration_bounds = array<i64: 1, 1>, scalar_prefetch = 0 : i64, scratch_operands = 1 : i64, tpu.core_type = #tpu.core_type<tc>, window_params = [{transform_indices = @transform_0, window_bounds = array<i64: 128, 128>}, {transform_indices = @transform_1, window_bounds = array<i64: 128, 128>}, {pipeline_mode = #tpu.pipeline_mode<synchronous>, transform_indices = @transform_2, window_bounds = array<i64: 128, 128>}, {pipeline_mode = #tpu.pipeline_mode<synchronous>, transform_indices = @transform_3, window_bounds = array<i64: 1, 128>}, {transform_indices = @transform_4, window_bounds = array<i64: 8, 128>}, {pipeline_mode = #tpu.pipeline_mode<synchronous>, transform_indices = @transform_5, window_bounds = array<i64: 128, 128>}, {transform_indices = @transform_6, window_bounds = array<i64: 1, 8, 128>}]} {
    %c0_i32 = arith.constant 0 : i32
    %0 = arith.cmpi eq, %arg1, %c0_i32 : i32
    %1 = arith.extui %0 : i1 to i32
    %c0_i32_0 = arith.constant 0 : i32
    %2 = arith.cmpi ne, %1, %c0_i32_0 : i32
    scf.if %2 {
      %cst_13 = arith.constant 0.000000e+00 : f32
      %14 = vector.broadcast %cst_13 : f32 to vector<128x128xf32>
      %c0_14 = arith.constant 0 : index
      %c0_15 = arith.constant 0 : index
      %15 = vector.load %arg9[%c0_14, %c0_15] : memref<128x128xf32, #tpu.memory_space<vmem>>, vector<128x128xf32>
      tpu.vector_store %arg9[%c0_14, %c0_15], %14 {strides = array<i32>} : memref<128x128xf32, #tpu.memory_space<vmem>>, vector<128x128xf32>,
    } else {
    }
    %c0 = arith.constant 0 : index
    %c0_1 = arith.constant 0 : index
    %3 = vector.load %arg3[%c0, %c0_1] : memref<128x128xf32, #tpu.memory_space<vmem>>, vector<128x128xf32>
    %c0_2 = arith.constant 0 : index
    %c0_3 = arith.constant 0 : index
    %4 = vector.load %arg4[%c0_2, %c0_3] : memref<128x128xf32, #tpu.memory_space<vmem>>, vector<128x128xf32>
    %cst = arith.constant dense<0.000000e+00> : vector<128x128xf32>
    %5 = tpu.matmul %3, %4, %cst {dimension_numbers = #tpu.dot_dimension_numbers<[1], [0], [0], [1], [0, 0, 1, 1], [], []>} : vector<128x128xf32>, vector<128x128xf32>, vector<128x128xf32> -> vector<128x128xf32>
    %c0_4 = arith.constant 0 : index
    %c0_5 = arith.constant 0 : index
    %6 = vector.load %arg9[%c0_4, %c0_5] : memref<128x128xf32, #tpu.memory_space<vmem>>, vector<128x128xf32>
    %c0_6 = arith.constant 0 : index
    %c0_7 = arith.constant 0 : index
    %7 = vector.load %arg2[%c0_6, %c0_7] : memref<128x128xf32, #tpu.memory_space<vmem>>, vector<128x128xf32>
    %cst_8 = arith.constant dense<0.000000e+00> : vector<128x128xf32>
    %8 = tpu.matmul %7, %5, %cst_8 {dimension_numbers = #tpu.dot_dimension_numbers<[1], [0], [0], [1], [0, 0, 1, 1], [], []>} : vector<128x128xf32>, vector<128x128xf32>, vector<128x128xf32> -> vector<128x128xf32>
    %9 = arith.addf %6, %8 : vector<128x128xf32>
    %c0_9 = arith.constant 0 : index
    %c0_10 = arith.constant 0 : index
    %10 = vector.load %arg9[%c0_9, %c0_10] : memref<128x128xf32, #tpu.memory_space<vmem>>, vector<128x128xf32>
    tpu.vector_store %arg9[%c0_9, %c0_10], %9 {strides = array<i32>} : memref<128x128xf32, #tpu.memory_space<vmem>>, vector<128x128xf32>,
    %c0_i32_11 = arith.constant 0 : i32
    %11 = arith.cmpi eq, %arg1, %c0_i32_11 : i32
    %12 = arith.extui %11 : i1 to i32
    %c0_i32_12 = arith.constant 0 : i32
    %13 = arith.cmpi ne, %12, %c0_i32_12 : i32
    scf.if %13 {
      %c0_13 = arith.constant 0 : index
      %c0_14 = arith.constant 0 : index
      %14 = vector.load %arg9[%c0_13, %c0_14] : memref<128x128xf32, #tpu.memory_space<vmem>>, vector<128x128xf32>
      %c0_15 = arith.constant 0 : index
      %c0_16 = arith.constant 0 : index
      %15 = vector.load %arg5[%c0_15, %c0_16] : memref<1x128xf32, #tpu.memory_space<vmem>>, vector<1x128xf32>
      %16 = vector.broadcast %15 : vector<1x128xf32> to vector<128x128xf32>
      %17 = arith.addf %14, %16 : vector<128x128xf32>
      %cst_17 = arith.constant 5.000000e-01 : f32
      %18 = vector.broadcast %cst_17 : f32 to vector<128x128xf32>
      %19 = arith.mulf %18, %17 : vector<128x128xf32>
      %cst_18 = arith.constant 0.707106769 : f32
      %20 = vector.broadcast %cst_18 : f32 to vector<128x128xf32>
      %21 = arith.mulf %17, %20 : vector<128x128xf32>
      %cst_19 = arith.constant 0.000000e+00 : f32
      %22 = vector.broadcast %cst_19 : f32 to vector<128x128xf32>
      %23 = arith.cmpf oge, %21, %22 : vector<128x128xf32>
      %cst_20 = arith.constant 1.000000e+00 : f32
      %cst_21 = arith.constant -1.000000e+00 : f32
      %24 = vector.broadcast %cst_20 : f32 to vector<128x128xf32>
      %25 = vector.broadcast %cst_21 : f32 to vector<128x128xf32>
      %26 = arith.select %23, %24, %25 : vector<128x128xi1>, vector<128x128xf32>
      %27 = math.absf %21 : vector<128x128xf32>
      %cst_22 = arith.constant 0.327591091 : f32
      %28 = vector.broadcast %cst_22 : f32 to vector<128x128xf32>
      %29 = arith.mulf %28, %27 : vector<128x128xf32>
      %cst_23 = arith.constant 1.000000e+00 : f32
      %30 = vector.broadcast %cst_23 : f32 to vector<128x128xf32>
      %31 = arith.addf %30, %29 : vector<128x128xf32>
      %cst_24 = arith.constant 1.000000e+00 : f32
      %32 = vector.broadcast %cst_24 : f32 to vector<128x128xf32>
      %33 = arith.divf %32, %31 : vector<128x128xf32>
      %cst_25 = arith.constant 1.06140542 : f32
      %34 = vector.broadcast %cst_25 : f32 to vector<128x128xf32>
      %35 = arith.mulf %34, %33 : vector<128x128xf32>
      %cst_26 = arith.constant -1.45315206 : f32
      %36 = vector.broadcast %cst_26 : f32 to vector<128x128xf32>
      %37 = arith.addf %35, %36 : vector<128x128xf32>
      %38 = arith.mulf %37, %33 : vector<128x128xf32>
      %cst_27 = arith.constant 1.42141378 : f32
      %39 = vector.broadcast %cst_27 : f32 to vector<128x128xf32>
      %40 = arith.addf %38, %39 : vector<128x128xf32>
      %41 = arith.mulf %40, %33 : vector<128x128xf32>
      %cst_28 = arith.constant -0.284496725 : f32
      %42 = vector.broadcast %cst_28 : f32 to vector<128x128xf32>
      %43 = arith.addf %41, %42 : vector<128x128xf32>
      %44 = arith.mulf %43, %33 : vector<128x128xf32>
      %cst_29 = arith.constant 0.254829586 : f32
      %45 = vector.broadcast %cst_29 : f32 to vector<128x128xf32>
      %46 = arith.addf %44, %45 : vector<128x128xf32>
      %47 = arith.mulf %46, %33 : vector<128x128xf32>
      %cst_30 = arith.constant 0.000000e+00 : f32
      %48 = vector.broadcast %cst_30 : f32 to vector<128x128xf32>
      %49 = arith.subf %48, %27 : vector<128x128xf32>
      %50 = arith.mulf %49, %27 : vector<128x128xf32>
      %51 = math.exp %50 : vector<128x128xf32>
      %52 = arith.mulf %47, %51 : vector<128x128xf32>
      %cst_31 = arith.constant 1.000000e+00 : f32
      %53 = vector.broadcast %cst_31 : f32 to vector<128x128xf32>
      %54 = arith.subf %53, %52 : vector<128x128xf32>
      %55 = arith.mulf %26, %54 : vector<128x128xf32>
      %cst_32 = arith.constant 1.000000e+00 : f32
      %56 = vector.broadcast %cst_32 : f32 to vector<128x128xf32>
      %57 = arith.addf %56, %55 : vector<128x128xf32>
      %58 = arith.mulf %19, %57 : vector<128x128xf32>
      %c0_33 = arith.constant 0 : index
      %c0_34 = arith.constant 0 : index
      %59 = vector.load %arg6[%c0_33, %c0_34] : memref<8x128xf32, #tpu.memory_space<vmem>>, vector<8x128xf32>
      %cst_35 = arith.constant dense<0.000000e+00> : vector<8x128xf32>
      %60 = tpu.matmul %59, %58, %cst_35 {dimension_numbers = #tpu.dot_dimension_numbers<[1], [0], [0], [1], [0, 0, 1, 1], [], []>} : vector<8x128xf32>, vector<128x128xf32>, vector<8x128xf32> -> vector<8x128xf32>
      %c0_36 = arith.constant 0 : index
      %c0_37 = arith.constant 0 : index
      %61 = vector.load %arg7[%c0_36, %c0_37] : memref<128x128xf32, #tpu.memory_space<vmem>>, vector<128x128xf32>
      %cst_38 = arith.constant dense<0.000000e+00> : vector<8x128xf32>
      %62 = tpu.matmul %60, %61, %cst_38 {dimension_numbers = #tpu.dot_dimension_numbers<[1], [0], [0], [1], [0, 0, 1, 1], [], []>} : vector<8x128xf32>, vector<128x128xf32>, vector<8x128xf32> -> vector<8x128xf32>
      %c0_39 = arith.constant 0 : index
      %c0_40 = arith.constant 0 : index
      %c0_41 = arith.constant 0 : index
      %63 = vector.load %arg8[%c0_39, %c0_40, %c0_41] : memref<1x8x128xf32, #tpu.memory_space<vmem>>, vector<1x8x128xf32>
      %64 = vector.shape_cast %63 : vector<1x8x128xf32> to vector<8x128xf32>
      %65 = vector.shape_cast %62 : vector<8x128xf32> to vector<1x8x128xf32>
      tpu.vector_store %arg8[%c0_39, %c0_40, %c0_41], %65 {strides = array<i32>} : memref<1x8x128xf32, #tpu.memory_space<vmem>>, vector<1x8x128xf32>,
    } else {
    }
    return
  }
  func.func @transform_0(%arg0: i32, %arg1: i32) -> (i32, i32) {
    %c0_i32 = arith.constant 0 : i32
    return %arg0, %arg1 : i32, i32
  }
  func.func @transform_1(%arg0: i32, %arg1: i32) -> (i32, i32) {
    %c0_i32 = arith.constant 0 : i32
    %c0_i32_0 = arith.constant 0 : i32
    return %arg1, %c0_i32 : i32, i32
  }
  func.func @transform_2(%arg0: i32, %arg1: i32) -> (i32, i32) {
    %c0_i32 = arith.constant 0 : i32
    %c0_i32_0 = arith.constant 0 : i32
    %c0_i32_1 = arith.constant 0 : i32
    return %c0_i32, %c0_i32_0 : i32, i32
  }
  func.func @transform_3(%arg0: i32, %arg1: i32) -> (i32, i32) {
    %c0_i32 = arith.constant 0 : i32
    %c0_i32_0 = arith.constant 0 : i32
    %c0_i32_1 = arith.constant 0 : i32
    return %c0_i32, %c0_i32_0 : i32, i32
  }
  func.func @transform_4(%arg0: i32, %arg1: i32) -> (i32, i32) {
    %c0_i32 = arith.constant 0 : i32
    %c0_i32_0 = arith.constant 0 : i32
    return %c0_i32, %arg0 : i32, i32
  }
  func.func @transform_5(%arg0: i32, %arg1: i32) -> (i32, i32) {
    %c0_i32 = arith.constant 0 : i32
    %c0_i32_0 = arith.constant 0 : i32
    %c0_i32_1 = arith.constant 0 : i32
    return %c0_i32, %c0_i32_0 : i32, i32
  }
  func.func @transform_6(%arg0: i32, %arg1: i32) -> (i32, i32, i32) {
    %c0_i32 = arith.constant 0 : i32
    %c0_i32_0 = arith.constant 0 : i32
    %c0_i32_1 = arith.constant 0 : i32
    return %arg0, %c0_i32, %c0_i32_0 : i32, i32, i32
  }
}

</mosaic_0001>

<bundles_post_ra>
// kernel: gcn_forward.1
= control target key start
LH: loop header
LB: loop body
LE: loop exit
PB: predicated region body
PF: predicated region fallthrough
CT: control target
= control target key end

     0   :  { %vm1528_vm11 = vmmov 0   ;;  %s2124_s2 = inlined_call_operand.vmem [shape: f32[128,128], index: 2, kind: input, shape index: {}]   ;;  %s2125_s1 = inlined_call_operand.vmem [shape: f32[128,128], index: 1, kind: input, shape index: {}]   ;;  %s2126_s0 = inlined_call_operand.vmem [shape: f32[128,128], index: 0, kind: input, shape index: {}]   ;;  %s2127_s3 = inlined_call_operand.vmem [shape: f32[1,128], index: 3, kind: input, shape index: {}]   ;;  %s2128_s5 = inlined_call_operand.vmem [shape: f32[128,128], index: 5, kind: input, shape index: {}]   ;;  %s2129_s4 = inlined_call_operand.vmem [shape: f32[8,128], index: 4, kind: input, shape index: {}]   ;;  %s2130_s6 = inlined_call_operand.vmem [shape: f32[1,8,128], index: 6, kind: output, shape index: {}]  }
   0x1   :  { %v59_v0 = vld [vmem:[%s2124_s2] sm:$0xff]  ;;  %v60_v1 = vld [vmem:[%s2124_s2 + $0x8] sm:$0xff]  ;;  %v61_v2 = vld [vmem:[%s2124_s2 + $0x10] sm:$0xff] }
   0x2   :  { %v1346_v3 = vpack.c.bf16 %v60_v1, %v59_v0  ;;  %v62_v4 = vld [vmem:[%s2124_s2 + $0x18] sm:$0xff]  ;;  %v63_v6 = vld [vmem:[%s2124_s2 + $0x20] sm:$0xff]  ;;  %v64_v7 = vld [vmem:[%s2124_s2 + $0x28] sm:$0xff] }
   0x3   :  { %v1350_v5 = vpack.c.bf16 %v62_v4, %v61_v2  ;;  %v1354_v8 = vpack.c.bf16 %v64_v7, %v63_v6  ;;  %v43_v9 = vld [vmem:[%s2125_s1] sm:$0xff]  ;;  %v65_v10 = vld [vmem:[%s2124_s2 + $0x30] sm:$0xff]  ;;  %v66_v11 = vld [vmem:[%s2124_s2 + $0x38] sm:$0xff] }
   0x4   :  { %1347 = vmatprep.subr.bf16.mxu0 %v1346_v3  ;;  %1196 = vmatprep.mubr.f32.mxu0 %v43_v9  ;;  %v1358_v12 = vpack.c.bf16 %v66_v11, %v65_v10  ;;  %v67_v13 = vld [vmem:[%s2124_s2 + $0x40] sm:$0xff]  ;;  %v68_v14 = vld [vmem:[%s2124_s2 + $0x48] sm:$0xff]  ;;  %v69_v16 = vld [vmem:[%s2124_s2 + $0x50] sm:$0xff] }
   0x5   :  { %1349 = vmatpush3.bf16.msra.mxu0 %v1346_v3  ;;  %v1362_v15 = vpack.c.bf16 %v68_v14, %v67_v13  ;;  %v70_v17 = vld [vmem:[%s2124_s2 + $0x58] sm:$0xff]  ;;  %v71_v19 = vld [vmem:[%s2124_s2 + $0x60] sm:$0xff]  ;;  %v72_v20 = vld [vmem:[%s2124_s2 + $0x68] sm:$0xff] }
   0x6   :  { %1351 = vmatprep.subr.bf16.mxu0 %v1350_v5  ;;  %v1366_v18 = vpack.c.bf16 %v70_v17, %v69_v16  ;;  %v1370_v21 = vpack.c.bf16 %v72_v20, %v71_v19  ;;  %v73_v22 = vld [vmem:[%s2124_s2 + $0x70] sm:$0xff]  ;;  %v74_v23 = vld [vmem:[%s2124_s2 + $0x78] sm:$0xff]  ;;  %v44_v25 = vld [vmem:[%s2125_s1 + $0x8] sm:$0xff]  ;;  %v1526_v16 = vmov 0.0|0.0  }
   0x7   :  { %v1374_v24 = vpack.c.bf16 %v74_v23, %v73_v22  ;;  %v45_v26 = vld [vmem:[%s2125_s1 + $0x10] sm:$0xff]  ;;  %v46_v27 = vld [vmem:[%s2125_s1 + $0x18] sm:$0xff]  ;;  %v47_v28 = vld [vmem:[%s2125_s1 + $0x20] sm:$0xff] }
   0x8   :  { %v48_v29 = vld [vmem:[%s2125_s1 + $0x28] sm:$0xff]  ;;  %v49_v30 = vld [vmem:[%s2125_s1 + $0x30] sm:$0xff]  ;;  %v50_v31 = vld [vmem:[%s2125_s1 + $0x38] sm:$0xff] }
   0x9   :  { %1353 = vmatpush3.bf16.msra.mxu0 %v1350_v5  ;;  %v51_v32 = vld [vmem:[%s2125_s1 + $0x40] sm:$0xff]  ;;  %v52_v33 = vld [vmem:[%s2125_s1 + $0x48] sm:$0xff]  ;;  %v53_v34 = vld [vmem:[%s2125_s1 + $0x50] sm:$0xff] }
   0xa   :  { %1355 = vmatprep.subr.bf16.mxu0 %v1354_v8  ;;  %v54_v35 = vld [vmem:[%s2125_s1 + $0x58] sm:$0xff]  ;;  %v55_v36 = vld [vmem:[%s2125_s1 + $0x60] sm:$0xff]  ;;  %v56_v37 = vld [vmem:[%s2125_s1 + $0x68] sm:$0xff] }
   0xb   :  { %v57_v38 = vld [vmem:[%s2125_s1 + $0x70] sm:$0xff]  ;;  %v58_v39 = vld [vmem:[%s2125_s1 + $0x78] sm:$0xff]  ;;  %v236_v40 = vld [vmem:[%s2126_s0] sm:$0xff] }
   0xc   :  { %1252 = vmatprep.mubr.f32.mxu1 %v236_v40  ;;  %v237_v1 = vld [vmem:[%s2126_s0 + $0x8] sm:$0xff]  ;;  %v238_v2 = vld [vmem:[%s2126_s0 + $0x10] sm:$0xff]  ;;  %v239_v3 = vld [vmem:[%s2126_s0 + $0x18] sm:$0xff] }
   0xd   :  { %1357 = vmatpush3.bf16.msra.mxu0 %v1354_v8  ;;  %v240_v4 = vld [vmem:[%s2126_s0 + $0x20] sm:$0xff]  ;;  %v241_v5 = vld [vmem:[%s2126_s0 + $0x28] sm:$0xff]  ;;  %v242_v6 = vld [vmem:[%s2126_s0 + $0x30] sm:$0xff] }
   0xe   :  { %1359 = vmatprep.subr.bf16.mxu0 %v1358_v12  ;;  %v243_v7 = vld [vmem:[%s2126_s0 + $0x38] sm:$0xff]  ;;  %v244_v8 = vld [vmem:[%s2126_s0 + $0x40] sm:$0xff]  ;;  %v245_v9 = vld [vmem:[%s2126_s0 + $0x48] sm:$0xff] }
   0xf   :  { %v246_v10 = vld [vmem:[%s2126_s0 + $0x50] sm:$0xff]  ;;  %v247_v11 = vld [vmem:[%s2126_s0 + $0x58] sm:$0xff]  ;;  %v249_v13 = vld [vmem:[%s2126_s0 + $0x68] sm:$0xff] }
  0x10   :  { %v250_v14 = vld [vmem:[%s2126_s0 + $0x70] sm:$0xff]  ;;  %v1714_v17 = vld [vmem:[%s2127_s3] ss:$0 sm:$0xff] }
  0x11   :  { %1361 = vmatpush3.bf16.msra.mxu0 %v1358_v12  ;;  %v248_v12 = vld [vmem:[%s2126_s0 + $0x60] sm:$0xff] }
  0x12   :  { %1363 = vmatprep.subr.bf16.mxu0 %v1362_v15 }
  0x15   :  { %1365 = vmatpush3.bf16.msra.mxu0 %v1362_v15  ;;  %v251_v15 = vld [vmem:[%s2126_s0 + $0x78] sm:$0xff] }
  0x16   :  { %1367 = vmatprep.subr.bf16.mxu0 %v1366_v18 }
  0x19   :  { %1369 = vmatpush3.bf16.msra.mxu0 %v1366_v18 }
  0x1a   :  { %1371 = vmatprep.subr.bf16.mxu0 %v1370_v21 }
  0x1d   :  { %1373 = vmatpush3.bf16.msra.mxu0 %v1370_v21 }
  0x1e   :  { %1375 = vmatprep.subr.bf16.mxu0 %v1374_v24 }
  0x21   :  { %1377 = vmatpush3.bf16.msra.mxu0 %v1374_v24 }
  0x22   :  { %1410 = vmatprep.subr.bf16.mxu0 %v1526_v16 }
  0x24   :  { %1197 = vmatmul.mubr.f32.vlgmr.msra.gmra.mrb[0].mxu0 %v44_v25 }
  0x25   :  { %1199 = vmatprep.mubr.f32.mxu0 %v45_v26 }
  0x28   :  { %1200 = vmatmul.mubr.f32.gmra.mrb[2].mxu0 %v46_v27 }
  0x29   :  { %1202 = vmatprep.mubr.f32.mxu0 %v47_v28 }
  0x2c   :  { %1203 = vmatmul.mubr.f32.gmra.mrb[4].mxu0 %v48_v29 }
  0x2d   :  { %1205 = vmatprep.mubr.f32.mxu0 %v49_v30 }
  0x30   :  { %1206 = vmatmul.mubr.f32.gmra.mrb[6].mxu0 %v50_v31 }
  0x31   :  { %1208 = vmatprep.mubr.f32.mxu0 %v51_v32 }
  0x34   :  { %1209 = vmatmul.mubr.f32.gmra.mrb[8].mxu0 %v52_v33 }
  0x35   :  { %1211 = vmatprep.mubr.f32.mxu0 %v53_v34 }
  0x38   :  { %1212 = vmatmul.mubr.f32.gmra.mrb[10].mxu0 %v54_v35 }
  0x39   :  { %1214 = vmatprep.mubr.f32.mxu0 %v55_v36 }
  0x3c   :  { %1215 = vmatmul.mubr.f32.gmra.mrb[12].mxu0 %v56_v37 }
  0x3d   :  { %1217 = vmatprep.mubr.f32.mxu0 %v57_v38 }
  0x40   :  { %1218 = vmatmul.mubr.f32.gmra.mrb[14].mxu0 %v58_v39 }
  0xf7   :  { %v1198_v41 = vpop.f32.mrb[0].mxu0 }
  0xf8   :  { %v141_v42 = vpop.f32.mrb[1].mxu0 }
  0xf9   :  { %v1378_v43 = vpack.c.bf16 %v1198_v41, %v141_v42 }
  0xfb   :  { %v1201_v44 = vpop.f32.mrb[2].mxu0  ;;  %1379 = vmatprep.subr.bf16.mxu1 %v1378_v43 }
  0xfc   :  { %v151_v45 = vpop.f32.mrb[3].mxu0  ;;  %1381 = vmatpush3.bf16.msra.mxu1 %v1378_v43 }
  0xfd   :  { %v1382_v46 = vpack.c.bf16 %v1201_v44, %v151_v45 }
  0xff   :  { %v1204_v47 = vpop.f32.mrb[4].mxu0  ;;  %1383 = vmatprep.subr.bf16.mxu1 %v1382_v46 }
 0x100   :  { %v161_v48 = vpop.f32.mrb[5].mxu0  ;;  %1385 = vmatpush3.bf16.msra.mxu1 %v1382_v46 }
 0x101   :  { %v1386_v49 = vpack.c.bf16 %v1204_v47, %v161_v48 }
 0x103   :  { %v1207_v50 = vpop.f32.mrb[6].mxu0  ;;  %1387 = vmatprep.subr.bf16.mxu1 %v1386_v49 }
 0x104   :  { %v171_v51 = vpop.f32.mrb[7].mxu0  ;;  %1389 = vmatpush3.bf16.msra.mxu1 %v1386_v49 }
 0x105   :  { %v1390_v52 = vpack.c.bf16 %v1207_v50, %v171_v51 }
 0x107   :  { %v1210_v53 = vpop.f32.mrb[8].mxu0  ;;  %1391 = vmatprep.subr.bf16.mxu1 %v1390_v52 }
 0x108   :  { %v181_v54 = vpop.f32.mrb[9].mxu0  ;;  %1393 = vmatpush3.bf16.msra.mxu1 %v1390_v52 }
 0x109   :  { %v1394_v55 = vpack.c.bf16 %v1210_v53, %v181_v54 }
 0x10b   :  { %v1213_v56 = vpop.f32.mrb[10].mxu0  ;;  %1395 = vmatprep.subr.bf16.mxu1 %v1394_v55 }
 0x10c   :  { %v191_v57 = vpop.f32.mrb[11].mxu0  ;;  %1397 = vmatpush3.bf16.msra.mxu1 %v1394_v55 }
 0x10d   :  { %v1398_v58 = vpack.c.bf16 %v1213_v56, %v191_v57 }
 0x10f   :  { %v1216_v59 = vpop.f32.mrb[12].mxu0  ;;  %1399 = vmatprep.subr.bf16.mxu1 %v1398_v58 }
 0x110   :  { %v201_v60 = vpop.f32.mrb[13].mxu0  ;;  %1401 = vmatpush3.bf16.msra.mxu1 %v1398_v58 }
 0x111   :  { %v1402_v61 = vpack.c.bf16 %v1216_v59, %v201_v60 }
 0x113   :  { %v1219_v62 = vpop.f32.mrb[14].mxu0  ;;  %1403 = vmatprep.subr.bf16.mxu1 %v1402_v61 }
 0x114   :  { %v211_v63 = vpop.f32.mrb[15].mxu0  ;;  %1405 = vmatpush3.bf16.msra.mxu1 %v1402_v61 }
 0x115   :  { %v1406_v0 = vpack.c.bf16 %v1219_v62, %v211_v63  ;;  %v1527_v62 = vmov -1.0  }
 0x117   :  { %1407 = vmatprep.subr.bf16.mxu1 %v1406_v0 }
 0x118   :  { %1409 = vmatpush3.bf16.msra.mxu1 %v1406_v0 }
 0x119   :  { %1434 = vmatprep.subr.bf16.mxu1 %v1526_v16 }
 0x11b   :  { %1253 = vmatmul.mubr.f32.vlgmr.msra.gmra.mrb[0].mxu1 %v237_v1 }
 0x11c   :  { %1255 = vmatprep.mubr.f32.mxu1 %v238_v2 }
 0x11f   :  { %1256 = vmatmul.mubr.f32.gmra.mrb[2].mxu1 %v239_v3 }
 0x120   :  { %1258 = vmatprep.mubr.f32.mxu1 %v240_v4 }
 0x123   :  { %1259 = vmatmul.mubr.f32.gmra.mrb[4].mxu1 %v241_v5 }
 0x124   :  { %1261 = vmatprep.mubr.f32.mxu1 %v242_v6 }
 0x127   :  { %1262 = vmatmul.mubr.f32.gmra.mrb[6].mxu1 %v243_v7 }
 0x128   :  { %1264 = vmatprep.mubr.f32.mxu1 %v244_v8 }
 0x12b   :  { %1265 = vmatmul.mubr.f32.gmra.mrb[8].mxu1 %v245_v9 }
 0x12c   :  { %1267 = vmatprep.mubr.f32.mxu1 %v246_v10 }
 0x12f   :  { %1268 = vmatmul.mubr.f32.gmra.mrb[10].mxu1 %v247_v11 }
 0x130   :  { %1270 = vmatprep.mubr.f32.mxu1 %v248_v12 }
 0x133   :  { %1271 = vmatmul.mubr.f32.gmra.mrb[12].mxu1 %v249_v13 }
 0x134   :  { %1273 = vmatprep.mubr.f32.mxu1 %v250_v14 }
 0x137   :  { %1274 = vmatmul.mubr.f32.gmra.mrb[14].mxu1 %v251_v15 }
 0x1ee   :  { %v1254_v18 = vpop.f32.mrb[0].mxu1 }
 0x1ef   :  { %v456_v19 = vadd.f32 %v1254_v18, %v1714_v17  ;;  %v318_v20 = vpop.f32.mrb[1].mxu1 }
 0x1f0   :  { %v455_v21 = vadd.f32 %v1714_v17, %v318_v20 }
 0x1f1   :  { %v488_v22 = vmul.f32 0.70710677, %v456_v19  ;;  %v1729_v47 = vmul.f32 0.5, %v456_v19 }
 0x1f2   :  { %v487_v23 = vmul.f32 0.70710677, %v455_v21  ;;  %v1257_v24 = vpop.f32.mrb[2].mxu1  ;;  %v1737_v53 = vmul.f32 0.5, %v455_v21 }
 0x1f3   :  { %v536_v25 = vand.u32 2147483647, %v488_v22  ;;  %v458_v26 = vadd.f32 %v1257_v24, %v1714_v17  ;;  %v328_v27 = vpop.f32.mrb[3].mxu1  ;;  %vm504_vm0 = vcmp.ge.f32.partialorder %v488_v22, 0.0 }
 0x1f4   :  { %v535_v28 = vand.u32 2147483647, %v487_v23  ;;  %v457_v29 = vadd.f32 %v1714_v17, %v328_v27  ;;  %vm503_vm1 = vcmp.ge.f32.partialorder %v487_v23, 0.0  ;;  %v1749_v63 = vsel %vm504_vm0, 1.0, %v1527_v62 }
 0x1f5   :  { %v552_v30 = vmul.f32 0.3275911, %v536_v25  ;;  %v1720_v32 = vmul.f32 0.70710677, %v458_v26  ;;  %v760_v34 = vsub.f32 0.0, %v536_v25  ;;  %v1753_v0 = vsel %vm503_vm1, 1.0, %v1527_v62 }
 0x1f6   :  { %v551_v31 = vmul.f32 0.3275911, %v535_v28  ;;  %v1722_v35 = vmul.f32 0.70710677, %v457_v29  ;;  %v1260_v36 = vpop.f32.mrb[4].mxu1  ;;  %v759_v43 = vsub.f32 0.0, %v535_v28 }
 0x1f7   :  { %v568_v33 = vadd.f32 1.0, %v552_v30  ;;  %v538_v38 = vand.u32 2147483647, %v1720_v32  ;;  %v338_v39 = vpop.f32.mrb[5].mxu1  ;;  %v776_v42 = vmul.f32 %v760_v34, %v536_v25  ;;  %v1727_v45 = vadd.f32 %v1260_v36, %v1714_v17 }
 0x1f8   :  { %v567_v37 = vadd.f32 1.0, %v551_v31  ;;  %v537_v44 = vand.u32 2147483647, %v1722_v35  ;;  %v1732_v49 = vadd.f32 %v1714_v17, %v338_v39  ;;  %v775_v58 = vmul.f32 %v759_v43, %v535_v28 }
 0x1f9   :  { %1462 = vrcp.f32 %v568_v33  ;;  %v554_v40 = vmul.f32 0.3275911, %v538_v38  ;;  %v762_v50 = vsub.f32 0.0, %v538_v38  ;;  %v1735_v52 = vmul.f32 0.70710677, %v1727_v45 }
 0x1fa   :  { %1464 = vrcp.f32 %v567_v37  ;;  %v1263_v41 = vpop.f32.mrb[6].mxu1  ;;  %v553_v51 = vmul.f32 0.3275911, %v537_v44  ;;  %v761_v54 = vsub.f32 0.0, %v537_v44  ;;  %v1740_v55 = vmul.f32 0.70710677, %v1732_v49 }
 0x1fb   :  { %v348_v46 = vpop.f32.mrb[7].mxu1  ;;  %v570_v48 = vadd.f32 1.0, %v554_v40  ;;  %v793_v57 = vmul.f32 1.442695, %v776_v42  ;;  %v540_v60 = vand.u32 2147483647, %v1735_v52  ;;  %v778_v3 = vmul.f32 %v762_v50, %v538_v38 }
 0x1fc   :  { %v569_v59 = vadd.f32 1.0, %v553_v51  ;;  %v1755_v1 = vmul.f32 0.5, %v458_v26  ;;  %v539_v2 = vand.u32 2147483647, %v1740_v55  ;;  %v1758_v4 = vmul.f32 0.5, %v457_v29 }
 0x1fd   :  { %1466 = vrcp.f32 %v570_v48  ;;  %v556_v5 = vmul.f32 0.3275911, %v540_v60  ;;  %vm506_vm2 = vcmp.ge.f32.partialorder %v1720_v32, 0.0  ;;  %v777_v6 = vmul.f32 %v761_v54, %v537_v44 }
 0x1fe   :  { %v1742_v56 = vpop.f32.mrb[8].mxu1  ;;  %1468 = vrcp.f32 %v569_v59  ;;  %v555_v7 = vmul.f32 0.3275911, %v539_v2  ;;  %v1762_v8 = vadd.f32 %v1263_v41, %v1714_v17  ;;  %v791_v11 = vmul.f32 1.442695, %v775_v58 }
 0x1ff   :  { %v1745_v61 = vpop.f32.mrb[9].mxu1  ;;  %1470 = vpow2.f32 %v793_v57  ;;  %v572_v12 = vadd.f32 1.0, %v556_v5  ;;  %v764_v13 = vsub.f32 0.0, %v540_v60  ;;  %v763_v20 = vsub.f32 0.0, %v539_v2 }
 0x200   :  { %v571_v19 = vadd.f32 1.0, %v555_v7  ;;  %v1774_v21 = vadd.f32 %v1714_v17, %v348_v46  ;;  %v797_v23 = vmul.f32 1.442695, %v778_v3  ;;  %v1778_v24 = vmul.f32 0.70710677, %v1762_v8 }
 0x201   :  { %1472 = vrcp.f32 %v572_v12  ;;  %v1783_v26 = vsel %vm506_vm2, 1.0, %v1527_v62  ;;  %v795_v27 = vmul.f32 1.442695, %v777_v6  ;;  %vm505_vm3 = vcmp.ge.f32.partialorder %v1722_v35, 0.0 }
 0x202   :  { %v1764_v9 = vpop.f32.mrb[10].mxu1  ;;  %1474 = vrcp.f32 %v571_v19  ;;  %v542_v30 = vand.u32 2147483647, %v1778_v24  ;;  %v780_v36 = vmul.f32 %v764_v13, %v540_v60  ;;  %v779_v32 = vmul.f32 %v763_v20, %v539_v2 }
 0x203   :  { %v1766_v10 = vpop.eup %1462  ;;  %v1768_v14 = vpop.f32.mrb[11].mxu1  ;;  %1476 = vpow2.f32 %v791_v11  ;;  %v1795_v37 = vmul.f32 0.70710677, %v1774_v21  ;;  %v1800_v42 = vsel %vm505_vm3, 1.0, %v1527_v62  ;;  %vm508_vm4 = vcmp.ge.f32.partialorder %v1735_v52, 0.0 }
 0x204   :  { %v1770_v15 = vpop.eup %1464  ;;  %v616_v18 = vmul.f32 1.0614054, %v1766_v10  ;;  %v558_v40 = vmul.f32 0.3275911, %v542_v30  ;;  %v766_v41 = vsub.f32 0.0, %v542_v30  ;;  %1478 = vpow2.f32 %v797_v23 }
 0x205   :  { %v615_v22 = vmul.f32 1.0614054, %v1770_v15  ;;  %v541_v43 = vand.u32 2147483647, %v1795_v37  ;;  %v801_v60 = vmul.f32 1.442695, %v780_v36  ;;  %v1884_v52 = vadd.f32 %v1764_v9, %v1714_v17 }
 0x206   :  { %v632_v25 = vadd.f32 -1.4531521, %v616_v18  ;;  %v1785_v28 = vpop.f32.mrb[12].mxu1  ;;  %v574_v51 = vadd.f32 1.0, %v558_v40  ;;  %v782_v54 = vmul.f32 %v766_v41, %v542_v30  ;;  %v799_v7 = vmul.f32 1.442695, %v779_v32 }
 0x207   :  { %v631_v29 = vadd.f32 -1.4531521, %v615_v22  ;;  %v1789_v31 = vpop.f32.mrb[13].mxu1  ;;  %v1791_v33 = vpop.eup %1466  ;;  %v557_v2 = vmul.f32 0.3275911, %v541_v43  ;;  %v765_v18 = vsub.f32 0.0, %v541_v43 }
 0x208   :  { %v648_v34 = vmul.f32 %v1766_v10, %v632_v25  ;;  %v618_v39 = vmul.f32 1.0614054, %v1791_v33  ;;  %v1805_v46 = vpop.eup %1468  ;;  %1480 = vrcp.f32 %v574_v51  ;;  %v805_v23 = vmul.f32 1.442695, %v782_v54 }
 0x209   :  { %v647_v38 = vmul.f32 %v1770_v15, %v631_v29  ;;  %v617_v59 = vmul.f32 1.0614054, %v1805_v46  ;;  %v1471_v3 = vpop.eup %1470  ;;  %v573_v13 = vadd.f32 1.0, %v557_v2  ;;  %1482 = vpow2.f32 %v795_v27 }
 0x20a   :  { %v664_v35 = vadd.f32 1.4214138, %v648_v34  ;;  %v1803_v44 = vpop.f32.mrb[14].mxu1  ;;  %v634_v50 = vadd.f32 -1.4531521, %v618_v39  ;;  %v781_v40 = vmul.f32 %v765_v18, %v541_v43  ;;  %v1825_v54 = vadd.f32 %v1742_v56, %v1714_v17 }
 0x20b   :  { %v663_v48 = vadd.f32 1.4214138, %v647_v38  ;;  %v1807_v57 = vpop.f32.mrb[15].mxu1  ;;  %v633_v12 = vadd.f32 -1.4531521, %v617_v59  ;;  %v1813_v19 = vpop.eup %1472  ;;  %1484 = vrcp.f32 %v573_v13  ;;  %vm507_vm5 = vcmp.ge.f32.partialorder %v1740_v55, 0.0 }
 0x20c   :  { %v680_v58 = vmul.f32 %v1766_v10, %v664_v35  ;;  %v650_v6 = vmul.f32 %v1791_v33, %v634_v50  ;;  %v1815_v25 = vpop.eup %1474  ;;  %v620_v34 = vmul.f32 1.0614054, %v1813_v19  ;;  %1486 = vpow2.f32 %v801_v60 }
 0x20d   :  { %v679_v5 = vmul.f32 %v1770_v15, %v663_v48  ;;  %v649_v30 = vmul.f32 %v1805_v46, %v633_v12  ;;  %v1477_v36 = vpop.eup %1476  ;;  %v619_v39 = vmul.f32 1.0614054, %v1815_v25  ;;  %1488 = vpow2.f32 %v799_v7 }
 0x20e   :  { %v696_v11 = vadd.f32 -0.28449672, %v680_v58  ;;  %v666_v22 = vadd.f32 1.4214138, %v650_v6  ;;  %v636_v35 = vadd.f32 -1.4531521, %v620_v34  ;;  %v1479_v58 = vpop.eup %1478  ;;  %1490 = vpow2.f32 %v805_v23 }
 0x20f   :  { %v695_v20 = vadd.f32 -0.28449672, %v679_v5  ;;  %v665_v27 = vadd.f32 1.4214138, %v649_v30  ;;  %v635_v51 = vadd.f32 -1.4531521, %v619_v39 }
 0x210   :  { %v712_v29 = vmul.f32 %v1766_v10, %v696_v11  ;;  %v682_v38 = vmul.f32 %v1791_v33, %v666_v22  ;;  %v652_v5 = vmul.f32 %v1813_v19, %v636_v35  ;;  %v803_v11 = vmul.f32 1.442695, %v781_v40 }
 0x211   :  { %v711_v32 = vmul.f32 %v1770_v15, %v695_v20  ;;  %v681_v2 = vmul.f32 %v1805_v46, %v665_v27  ;;  %v651_v60 = vmul.f32 %v1815_v25, %v635_v51  ;;  %v476_v55 = vmul.f32 0.5, %v1727_v45 }
 0x212   :  { %v728_v41 = vadd.f32 0.2548296, %v712_v29  ;;  %v698_v50 = vadd.f32 -0.28449672, %v682_v38  ;;  %v668_v18 = vadd.f32 1.4214138, %v652_v5  ;;  %v1833_v56 = vpop.eup %1480  ;;  %1492 = vpow2.f32 %v803_v11 }
 0x213   :  { %v727_v48 = vadd.f32 0.2548296, %v711_v32  ;;  %v697_v13 = vadd.f32 -0.28449672, %v681_v2  ;;  %v667_v22 = vadd.f32 1.4214138, %v651_v60  ;;  %v1483_v32 = vpop.eup %1482 }
 0x214   :  { %v744_v59 = vmul.f32 %v1766_v10, %v728_v41  ;;  %v714_v6 = vmul.f32 %v1791_v33, %v698_v50  ;;  %v1836_v29 = vmul.f32 0.70710677, %v1825_v54  ;;  %v684_v30 = vmul.f32 %v1813_v19, %v668_v18 }
 0x215   :  { %v743_v43 = vmul.f32 %v1770_v15, %v727_v48  ;;  %v713_v15 = vmul.f32 %v1805_v46, %v697_v13  ;;  %v622_v34 = vmul.f32 1.0614054, %v1833_v56  ;;  %v683_v23 = vmul.f32 %v1815_v25, %v667_v22 }
 0x216   :  { %v824_v12 = vmul.f32 %v1471_v3, %v744_v59  ;;  %v730_v10 = vadd.f32 0.2548296, %v714_v6  ;;  %v700_v41 = vadd.f32 -0.28449672, %v684_v30  ;;  %vm510_vm6 = vcmp.ge.f32.partialorder %v1778_v24, 0.0 }
 0x217   :  { %v823_v20 = vmul.f32 %v1477_v36, %v743_v43  ;;  %v1843_v36 = vpop.eup %1484  ;;  %v729_v40 = vadd.f32 0.2548296, %v713_v15  ;;  %v638_v27 = vadd.f32 -1.4531521, %v622_v34  ;;  %v699_v50 = vadd.f32 -0.28449672, %v683_v23 }
 0x218   :  { %v840_v7 = vsub.f32 1.0, %v824_v12  ;;  %v746_v38 = vmul.f32 %v1791_v33, %v730_v10  ;;  %v621_v33 = vmul.f32 1.0614054, %v1843_v36  ;;  %v1487_v51 = vpop.eup %1486  ;;  %v716_v5 = vmul.f32 %v1813_v19, %v700_v41 }
 0x219   :  { %v839_v3 = vsub.f32 1.0, %v823_v20  ;;  %v745_v2 = vmul.f32 %v1805_v46, %v729_v40  ;;  %v715_v60 = vmul.f32 %v1815_v25, %v699_v50  ;;  %v1489_v12 = vpop.eup %1488  ;;  %v1893_v45 = vmul.f32 0.70710677, %v1884_v52 }
 0x21a   :  { %v856_v39 = vmul.f32 %v840_v7, %v1749_v63  ;;  %v826_v48 = vmul.f32 %v1479_v58, %v746_v38  ;;  %v654_v63 = vmul.f32 %v1833_v56, %v638_v27  ;;  %v637_v11 = vadd.f32 -1.4531521, %v621_v33  ;;  %v1491_v7 = vpop.eup %1490 }
 0x21b   :  { %v855_v35 = vmul.f32 %v839_v3, %v1753_v0  ;;  %v825_v58 = vmul.f32 %v1483_v32, %v745_v2  ;;  %v732_v13 = vadd.f32 0.2548296, %v716_v5  ;;  %v731_v46 = vadd.f32 0.2548296, %v715_v60 }
 0x21c   :  { %v872_v59 = vadd.f32 1.0, %v856_v39  ;;  %v842_v6 = vsub.f32 1.0, %v826_v48  ;;  %v670_v18 = vadd.f32 1.4214138, %v654_v63  ;;  %v653_v22 = vmul.f32 %v1843_v36, %v637_v11  ;;  %v1493_v41 = vpop.eup %1492 }
 0x21d   :  { %v871_v43 = vadd.f32 1.0, %v855_v35  ;;  %v841_v15 = vsub.f32 1.0, %v825_v58  ;;  %v748_v30 = vmul.f32 %v1813_v19, %v732_v13  ;;  %v544_v3 = vand.u32 2147483647, %v1836_v29 }
 0x21e   :  { %v888_v0 = vmul.f32 %v872_v59, %v1729_v47  ;;  %v858_v10 = vmul.f32 %v842_v6, %v1783_v26  ;;  %v686_v34 = vmul.f32 %v1833_v56, %v670_v18  ;;  %v747_v32 = vmul.f32 %v1815_v25, %v731_v46 }
 0x21f   :  { %v887_v20 = vmul.f32 %v871_v43, %v1737_v53  ;;  %v669_v23 = vadd.f32 1.4214138, %v653_v22  ;;  %v857_v53 = vmul.f32 %v841_v15, %v1800_v42  ;;  %v828_v39 = vmul.f32 %v1487_v51, %v748_v30 }
 0x220   :  { %v874_v47 = vadd.f32 1.0, %v858_v10  ;;  %v702_v26 = vadd.f32 -0.28449672, %v686_v34  ;;  %v560_v40 = vmul.f32 0.3275911, %v544_v3  ;;  %v827_v35 = vmul.f32 %v1489_v12, %v747_v32 }
 0x221   :  { %v1411_v38 = vpack.c.bf16 %v888_v0, %v887_v20  ;;  %v685_v19 = vmul.f32 %v1843_v36, %v669_v23  ;;  %v1867_v48 = vadd.f32 %v1714_v17, %v1745_v61  ;;  %v873_v50 = vadd.f32 1.0, %v857_v53 }
 0x222   :  { %v890_v27 = vmul.f32 %v874_v47, %v1755_v1  ;;  %v844_v33 = vsub.f32 1.0, %v828_v39  ;;  %v718_v25 = vmul.f32 %v1833_v56, %v702_v26  ;;  %v576_v59 = vadd.f32 1.0, %v560_v40 }
 0x223   :  { %1412 = vmatpush3.bf16.msra.mxu0 %v1411_v38  ;;  %v524_v42 = vsel %vm508_vm4, 1.0, %v1527_v62  ;;  %v523_v1 = vsel %vm507_vm5, 1.0, %v1527_v62  ;;  %v843_v51 = vsub.f32 1.0, %v827_v35  ;;  %v701_v2 = vadd.f32 -0.28449672, %v685_v19 }
 0x224   :  { %1413 = vmatprep.subr.bf16.mxu0 %v1526_v16  ;;  %v889_v61 = vmul.f32 %v873_v50, %v1758_v4  ;;  %v860_v5 = vmul.f32 %v844_v33, %v524_v42  ;;  %v734_v63 = vadd.f32 0.2548296, %v718_v25  ;;  %1494 = vrcp.f32 %v576_v59 }
 0x225   :  { %v859_v43 = vmul.f32 %v843_v51, %v523_v1  ;;  %v717_v6 = vmul.f32 %v1843_v36, %v701_v2  ;;  %v1880_v60 = vmul.f32 0.70710677, %v1867_v48  ;;  %v475_v4 = vmul.f32 0.5, %v1732_v49 }
 0x226   :  { %v1414_v11 = vpack.c.bf16 %v890_v27, %v889_v61  ;;  %v876_v12 = vadd.f32 1.0, %v860_v5  ;;  %v750_v0 = vmul.f32 %v1833_v56, %v734_v63  ;;  %v768_v10 = vsub.f32 0.0, %v544_v3 }
 0x227   :  { %v875_v58 = vadd.f32 1.0, %v859_v43  ;;  %v733_v13 = vadd.f32 0.2548296, %v717_v6  ;;  %v543_v46 = vand.u32 2147483647, %v1880_v60  ;;  %v526_v49 = vsel %vm510_vm6, 1.0, %v1527_v62 }
 0x228   :  { %v892_v18 = vmul.f32 %v876_v12, %v476_v55  ;;  %v830_v20 = vmul.f32 %v1491_v7, %v750_v0  ;;  %1415 = vmatpush3.bf16.msra.mxu0 %v1414_v11  ;;  %v1899_v24 = vadd.f32 %v1714_v17, %v1768_v14  ;;  %vm509_vm7 = vcmp.ge.f32.partialorder %v1795_v37, 0.0 }
 0x229   :  { %v891_v9 = vmul.f32 %v875_v58, %v475_v4  ;;  %v749_v22 = vmul.f32 %v1843_v36, %v733_v13  ;;  %1416 = vmatprep.subr.bf16.mxu0 %v1526_v16  ;;  %v559_v15 = vmul.f32 0.3275911, %v543_v46  ;;  %v546_v34 = vand.u32 2147483647, %v1893_v45 }
 0x22a   :  { %v846_v56 = vsub.f32 1.0, %v830_v20  ;;  %v784_v38 = vmul.f32 %v768_v10, %v544_v3  ;;  %v478_v32 = vmul.f32 0.5, %v1762_v8  ;;  %v525_v14 = vsel %vm509_vm7, 1.0, %v1527_v62 }
 0x22b   :  { %v1417_v7 = vpack.c.bf16 %v892_v18, %v891_v9  ;;  %v829_v30 = vmul.f32 %v1493_v41, %v749_v22  ;;  %v575_v47 = vadd.f32 1.0, %v559_v15  ;;  %v562_v53 = vmul.f32 0.3275911, %v546_v34 }
 0x22c   :  { %v862_v36 = vmul.f32 %v846_v56, %v526_v49  ;;  %v1908_v40 = vmul.f32 0.70710677, %v1899_v24  ;;  %v1914_v8 = vadd.f32 %v1785_v28, %v1714_v17  ;;  %v477_v27 = vmul.f32 0.5, %v1774_v21 }
 0x22d   :  { %v845_v23 = vsub.f32 1.0, %v829_v30  ;;  %1418 = vmatpush3.bf16.msra.mxu0 %v1417_v7  ;;  %1496 = vrcp.f32 %v575_v47  ;;  %v578_v41 = vadd.f32 1.0, %v562_v53  ;;  %v809_v35 = vmul.f32 1.442695, %v784_v38 }
 0x22e   :  { %v1904_v39 = vpop.eup %1494  ;;  %v878_v26 = vadd.f32 1.0, %v862_v36  ;;  %1419 = vmatprep.subr.bf16.mxu0 %v1526_v16  ;;  %v545_v19 = vand.u32 2147483647, %v1908_v40  ;;  %vm512_vm8 = vcmp.ge.f32.partialorder %v1836_v29, 0.0  ;;  %v767_v51 = vsub.f32 0.0, %v543_v46 }
 0x22f   :  { %v861_v37 = vmul.f32 %v845_v23, %v525_v14  ;;  %v624_v3 = vmul.f32 1.0614054, %v1904_v39  ;;  %1498 = vrcp.f32 %v578_v41  ;;  %v1921_v2 = vmul.f32 0.70710677, %v1914_v8 }
 0x230   :  { %v894_v50 = vmul.f32 %v878_v26, %v478_v32  ;;  %v561_v59 = vmul.f32 0.3275911, %v545_v19  ;;  %v770_v28 = vsub.f32 0.0, %v546_v34  ;;  %v1925_v21 = vadd.f32 %v1714_v17, %v1789_v31 }
 0x231   :  { %v877_v33 = vadd.f32 1.0, %v861_v37  ;;  %v640_v25 = vadd.f32 -1.4531521, %v624_v3  ;;  %v1929_v5 = vadd.f32 %v1803_v44, %v1714_v17  ;;  %1500 = vpow2.f32 %v809_v35 }
 0x232   :  { %v577_v61 = vadd.f32 1.0, %v561_v59  ;;  %v548_v6 = vand.u32 2147483647, %v1921_v2  ;;  %v1933_v11 = vmul.f32 0.5, %v1825_v54  ;;  %vm511_vm9 = vcmp.ge.f32.partialorder %v1880_v60, 0.0 }
 0x233   :  { %v893_v42 = vmul.f32 %v877_v33, %v477_v27  ;;  %v656_v1 = vmul.f32 %v1904_v39, %v640_v25  ;;  %v783_v12 = vmul.f32 %v767_v51, %v543_v46  ;;  %v1938_v0 = vmul.f32 0.70710677, %v1925_v21 }
 0x234   :  { %1502 = vrcp.f32 %v577_v61  ;;  %v564_v31 = vmul.f32 0.3275911, %v548_v6  ;;  %v1945_v4 = vsel %vm512_vm8, 1.0, %v1527_v62  ;;  %v1948_v54 = vmul.f32 0.5, %v1867_v48 }
 0x235   :  { %v1420_v63 = vpack.c.bf16 %v894_v50, %v893_v42  ;;  %v672_v43 = vadd.f32 1.4214138, %v656_v1  ;;  %v786_v58 = vmul.f32 %v770_v28, %v546_v34  ;;  %v1951_v13 = vmul.f32 0.70710677, %v1929_v5 }
 0x236   :  { %v769_v10 = vsub.f32 0.0, %v545_v19  ;;  %v580_v46 = vadd.f32 1.0, %v564_v31  ;;  %v1958_v29 = vsel %vm511_vm9, 1.0, %v1527_v62  ;;  %v1961_v9 = vmul.f32 0.5, %v1884_v52 }
 0x237   :  { %v688_v55 = vmul.f32 %v1904_v39, %v672_v43  ;;  %1421 = vmatpush3.bf16.msra.mxu0 %v1420_v63  ;;  %v1940_v44 = vpop.eup %1496  ;;  %v547_v48 = vand.u32 2147483647, %v1938_v0  ;;  %v1965_v22 = vand.u32 2147483647, %v1951_v13  ;;  %v807_v7 = vmul.f32 1.442695, %v783_v12 }
 0x238   :  { %1422 = vmatprep.subr.bf16.mxu0 %v1526_v16  ;;  %v623_v20 = vmul.f32 1.0614054, %v1940_v44  ;;  %1504 = vrcp.f32 %v580_v46  ;;  %vm514_vm10 = vcmp.ge.f32.partialorder %v1893_v45, 0.0  ;;  %v772_v30 = vsub.f32 0.0, %v548_v6  ;;  %v977_v46 = vld [vmem:[%s2128_s5 + $0x18] sm:$0xff] }
 0x239   :  { %v704_v18 = vadd.f32 -0.28449672, %v688_v55  ;;  %v1967_v49 = vpop.eup %1498  ;;  %v563_v34 = vmul.f32 0.3275911, %v547_v48  ;;  %v813_v38 = vmul.f32 1.442695, %v786_v58  ;;  %v785_v47 = vmul.f32 %v769_v10, %v545_v19 }
 0x23a   :  { %v639_v15 = vadd.f32 -1.4531521, %v623_v20  ;;  %v626_v60 = vmul.f32 1.0614054, %v1967_v49  ;;  %v566_v53 = vmul.f32 0.3275911, %v1965_v22  ;;  %v1976_v26 = vadd.f32 %v1714_v17, %v1807_v57 }
 0x23b   :  { %v720_v56 = vmul.f32 %v1904_v39, %v704_v18  ;;  %v579_v23 = vadd.f32 1.0, %v563_v34  ;;  %v1501_v14 = vpop.eup %1500  ;;  %1506 = vpow2.f32 %v807_v7  ;;  %v771_v41 = vsub.f32 0.0, %v547_v48  ;;  %v974_v55 = vld [vmem:[%s2128_s5] sm:$0xff]  ;;  %v975_v20 = vld [vmem:[%s2128_s5 + $0x8] sm:$0xff]  ;;  %v976_v10 = vld [vmem:[%s2128_s5 + $0x10] sm:$0xff] }
 0x23c   :  { %v655_v36 = vmul.f32 %v1940_v44, %v639_v15  ;;  %v642_v32 = vadd.f32 -1.4531521, %v626_v60  ;;  %v788_v50 = vmul.f32 %v772_v30, %v548_v6  ;;  %v582_v19 = vadd.f32 1.0, %v566_v53 }
 0x23d   :  { %v736_v52 = vadd.f32 0.2548296, %v720_v56  ;;  %1508 = vrcp.f32 %v579_v23  ;;  %v811_v17 = vmul.f32 1.442695, %v785_v47  ;;  %v787_v51 = vmul.f32 %v771_v41, %v547_v48 }
 0x23e   :  { %v671_v3 = vadd.f32 1.4214138, %v655_v36  ;;  %v1979_v27 = vpop.eup %1502  ;;  %v658_v35 = vmul.f32 %v1967_v49, %v642_v32  ;;  %1510 = vpow2.f32 %v813_v38  ;;  %v1529_v28 = vmov 0.0  }
 0x23f   :  { %v752_v37 = vmul.f32 %v1904_v39, %v736_v52  ;;  %v625_v59 = vmul.f32 1.0614054, %v1979_v27  ;;  %v1985_v39 = vmul.f32 0.70710677, %v1976_v26  ;;  %1512 = vrcp.f32 %v582_v19  ;;  %1308 = vmatprep.mubr.msk.f32.mxu0 %vm1528_vm11, %v1529_v28  ;;  %1343 = vmatprep.mubr.msk.f32.mxu1 %vm1528_vm11, %v1529_v28 }
 0x240   :  { %v687_v25 = vmul.f32 %v1940_v44, %v671_v3  ;;  %v674_v57 = vadd.f32 1.4214138, %v658_v35  ;;  %v1990_v61 = vsel %vm514_vm10, 1.0, %v1527_v62  ;;  %v817_v43 = vmul.f32 1.442695, %v788_v50 }
 0x241   :  { %v832_v33 = vmul.f32 %v1501_v14, %v752_v37  ;;  %v641_v1 = vadd.f32 -1.4531521, %v625_v59  ;;  %v1994_v6 = vand.u32 2147483647, %v1985_v39  ;;  %v774_v45 = vsub.f32 0.0, %v1965_v22 }
 0x242   :  { %v703_v42 = vadd.f32 -0.28449672, %v687_v25  ;;  %v690_v63 = vmul.f32 %v1967_v49, %v674_v57  ;;  %v1999_v12 = vpop.eup %1504  ;;  %1514 = vpow2.f32 %v811_v17  ;;  %v815_v30 = vmul.f32 1.442695, %v787_v51 }
 0x243   :  { %v848_v31 = vsub.f32 1.0, %v832_v33  ;;  %v657_v18 = vmul.f32 %v1979_v27, %v641_v1  ;;  %v628_v56 = vmul.f32 1.0614054, %v1999_v12  ;;  %v565_v15 = vmul.f32 0.3275911, %v1994_v6 }
 0x244   :  { %v719_v58 = vmul.f32 %v1940_v44, %v703_v42  ;;  %v706_v48 = vadd.f32 -0.28449672, %v690_v63  ;;  %v1435_v38 = vpack.c.bf16 %v975_v20, %v974_v55  ;;  %1516 = vpow2.f32 %v817_v43  ;;  %v981_v20 = vld [vmem:[%s2128_s5 + $0x38] sm:$0xff] }
 0x245   :  { %v673_v60 = vadd.f32 1.4214138, %v657_v18  ;;  %v644_v52 = vadd.f32 -1.4531521, %v628_v56  ;;  %v581_v36 = vadd.f32 1.0, %v565_v15  ;;  %v1507_v47 = vpop.eup %1506  ;;  %v864_v32 = vmul.f32 %v848_v31, %v1945_v4  ;;  %v979_v4 = vld [vmem:[%s2128_s5 + $0x28] sm:$0xff] }
 0x246   :  { %v735_v7 = vadd.f32 0.2548296, %v719_v58  ;;  %v722_v34 = vmul.f32 %v1967_v49, %v706_v48  ;;  %1436 = vmatpush3.bf16.msra.mxu1 %v1435_v38  ;;  %v1438_v41 = vpack.c.bf16 %v977_v46, %v976_v10  ;;  %v790_v33 = vmul.f32 %v774_v45, %v1965_v22  ;;  %v980_v45 = vld [vmem:[%s2128_s5 + $0x30] sm:$0xff] }
 0x247   :  { %v689_v53 = vmul.f32 %v1979_v27, %v673_v60  ;;  %v2019_v14 = vpop.eup %1508  ;;  %v660_v3 = vmul.f32 %v1999_v12, %v644_v52  ;;  %1518 = vrcp.f32 %v581_v36  ;;  %1437 = vmatprep.subr.bf16.mxu1 %v1526_v16  ;;  %vm513_vm12 = vcmp.ge.f32.partialorder %v1908_v40, 0.0  ;;  %v984_v40 = vld [vmem:[%s2128_s5 + $0x50] sm:$0xff] }
 0x248   :  { %v751_v23 = vmul.f32 %v1940_v44, %v735_v7  ;;  %v738_v37 = vadd.f32 0.2548296, %v722_v34  ;;  %v627_v19 = vmul.f32 1.0614054, %v2019_v14  ;;  %v978_v44 = vld [vmem:[%s2128_s5 + $0x20] sm:$0xff]  ;;  %v1511_v25 = vpop.eup %1510  ;;  %1520 = vpow2.f32 %v815_v30 }
 0x249   :  { %v705_v50 = vadd.f32 -0.28449672, %v689_v53  ;;  %v676_v17 = vadd.f32 1.4214138, %v660_v3  ;;  %v2033_v57 = vpop.eup %1512  ;;  %v880_v22 = vadd.f32 1.0, %v864_v32  ;;  %v1441_v55 = vpack.c.bf16 %v979_v4, %v978_v44 }
 0x24a   :  { %v831_v35 = vmul.f32 %v1507_v47, %v751_v23  ;;  %v754_v59 = vmul.f32 %v1967_v49, %v738_v37  ;;  %v643_v51 = vadd.f32 -1.4531521, %v627_v19  ;;  %v630_v43 = vmul.f32 1.0614054, %v2033_v57  ;;  %1439 = vmatpush3.bf16.msra.mxu1 %v1438_v41 }
 0x24b   :  { %v721_v1 = vmul.f32 %v1979_v27, %v705_v50  ;;  %v692_v63 = vmul.f32 %v1999_v12, %v676_v17  ;;  %v821_v18 = vmul.f32 1.442695, %v790_v33  ;;  %1440 = vmatprep.subr.bf16.mxu1 %v1526_v16  ;;  %v773_v56 = vsub.f32 0.0, %v1994_v6 }
 0x24c   :  { %v847_v42 = vsub.f32 1.0, %v831_v35  ;;  %v834_v28 = vmul.f32 %v1511_v25, %v754_v59  ;;  %v659_v58 = vmul.f32 %v2019_v14, %v643_v51  ;;  %v646_v48 = vadd.f32 -1.4531521, %v630_v43 }
 0x24d   :  { %v737_v31 = vadd.f32 0.2548296, %v721_v1  ;;  %v708_v46 = vadd.f32 -0.28449672, %v692_v63  ;;  %v896_v15 = vmul.f32 %v880_v22, %v1933_v11  ;;  %v1444_v38 = vpack.c.bf16 %v981_v20, %v980_v45  ;;  %v982_v11 = vld [vmem:[%s2128_s5 + $0x40] sm:$0xff] }
 0x24e   :  { %v863_v49 = vmul.f32 %v847_v42, %v1958_v29  ;;  %v850_v10 = vsub.f32 1.0, %v834_v28  ;;  %v1515_v29 = vpop.eup %1514  ;;  %v675_v30 = vadd.f32 1.4214138, %v659_v58  ;;  %v662_v36 = vmul.f32 %v2033_v57, %v646_v48  ;;  %1442 = vmatpush3.bf16.msra.mxu1 %v1441_v55 }
 0x24f   :  { %v753_v60 = vmul.f32 %v1979_v27, %v737_v31  ;;  %v724_v52 = vmul.f32 %v1999_v12, %v708_v46  ;;  %v1517_v47 = vpop.eup %1516  ;;  %1522 = vpow2.f32 %v821_v18  ;;  %1443 = vmatprep.subr.bf16.mxu1 %v1526_v16  ;;  %v983_v27 = vld [vmem:[%s2128_s5 + $0x48] sm:$0xff]  ;;  %v529_v4 = vsel %vm513_vm12, 1.0, %v1527_v62 }
 0x250   :  { %v879_v7 = vadd.f32 1.0, %v863_v49  ;;  %v866_v34 = vmul.f32 %v850_v10, %v1990_v61  ;;  %v691_v53 = vmul.f32 %v2019_v14, %v675_v30  ;;  %v678_v41 = vadd.f32 1.4214138, %v662_v36  ;;  %v987_v46 = vld [vmem:[%s2128_s5 + $0x68] sm:$0xff] }
 0x251   :  { %v833_v23 = vmul.f32 %v1515_v29, %v753_v60  ;;  %v2062_v61 = vpop.eup %1518  ;;  %v740_v3 = vadd.f32 0.2548296, %v724_v52  ;;  %v1447_v17 = vpack.c.bf16 %v983_v27, %v982_v11  ;;  %v481_v22 = vmul.f32 0.5, %v1899_v24 }
 0x252   :  { %v895_v32 = vmul.f32 %v879_v7, %v1948_v54  ;;  %v882_v37 = vadd.f32 1.0, %v866_v34  ;;  %v789_v54 = vmul.f32 %v773_v56, %v1994_v6  ;;  %v707_v19 = vadd.f32 -0.28449672, %v691_v53  ;;  %v1521_v44 = vpop.eup %1520  ;;  %1445 = vmatpush3.bf16.msra.mxu1 %v1444_v38  ;;  %v988_v38 = vld [vmem:[%s2128_s5 + $0x70] sm:$0xff] }
 0x253   :  { %v849_v50 = vsub.f32 1.0, %v833_v23  ;;  %v629_v33 = vmul.f32 1.0614054, %v2062_v61  ;;  %v756_v25 = vmul.f32 %v1999_v12, %v740_v3  ;;  %v694_v59 = vmul.f32 %v2033_v57, %v678_v41  ;;  %1446 = vmatprep.subr.bf16.mxu1 %v1526_v16  ;;  %v985_v12 = vld [vmem:[%s2128_s5 + $0x58] sm:$0xff] }
 0x254   :  { %v1423_v35 = vpack.c.bf16 %v896_v15, %v895_v32  ;;  %v723_v6 = vmul.f32 %v2019_v14, %v707_v19  ;;  %vm516_vm13 = vcmp.ge.f32.partialorder %v1921_v2, 0.0  ;;  %v819_v24 = vmul.f32 1.442695, %v789_v54 }
 0x255   :  { %v865_v42 = vmul.f32 %v849_v50, %v529_v4  ;;  %v645_v1 = vadd.f32 -1.4531521, %v629_v33  ;;  %v836_v51 = vmul.f32 %v1517_v47, %v756_v25  ;;  %v710_v28 = vadd.f32 -0.28449672, %v694_v59 }
 0x256   :  { %1424 = vmatpush3.bf16.msra.mxu0 %v1423_v35  ;;  %v898_v63 = vmul.f32 %v882_v37, %v1961_v9  ;;  %v739_v55 = vadd.f32 0.2548296, %v723_v6  ;;  %1448 = vmatpush3.bf16.msra.mxu1 %v1447_v17  ;;  %v1450_v18 = vpack.c.bf16 %v985_v12, %v984_v40  ;;  %v532_v20 = vsel %vm516_vm13, 1.0, %v1527_v62  ;;  %v986_v9 = vld [vmem:[%s2128_s5 + $0x60] sm:$0xff] }
 0x257   :  { %1425 = vmatprep.subr.bf16.mxu0 %v1526_v16  ;;  %v881_v43 = vadd.f32 1.0, %v865_v42  ;;  %v661_v49 = vmul.f32 %v2062_v61, %v645_v1  ;;  %v852_v31 = vsub.f32 1.0, %v836_v51  ;;  %v726_v58 = vmul.f32 %v2033_v57, %v710_v28  ;;  %1449 = vmatprep.subr.bf16.mxu1 %v1526_v16 }
 0x258   :  { %v755_v2 = vmul.f32 %v2019_v14, %v739_v55  ;;  %1524 = vpow2.f32 %v819_v24  ;;  %vm515_vm14 = vcmp.ge.f32.partialorder %v1938_v0, 0.0  ;;  %v1453_v30 = vpack.c.bf16 %v987_v46, %v986_v9  ;;  %v989_v0 = vld [vmem:[%s2128_s5 + $0x78] sm:$0xff] }
 0x259   :  { %v897_v45 = vmul.f32 %v881_v43, %v481_v22  ;;  %v677_v10 = vadd.f32 1.4214138, %v661_v49  ;;  %v868_v48 = vmul.f32 %v852_v31, %v532_v20  ;;  %v742_v56 = vadd.f32 0.2548296, %v726_v58  ;;  %v1523_v29 = vpop.eup %1522 }
 0x25a   :  { %v835_v7 = vmul.f32 %v1521_v44, %v755_v2  ;;  %1451 = vmatpush3.bf16.msra.mxu1 %v1450_v18  ;;  %v531_v47 = vsel %vm515_vm14, 1.0, %v1527_v62  ;;  %vm518_vm15 = vcmp.ge.f32.partialorder %v1951_v13, 0.0  ;;  %v1456_v27 = vpack.c.bf16 %v989_v0, %v988_v38 }
 0x25b   :  { %v1426_v15 = vpack.c.bf16 %v898_v63, %v897_v45  ;;  %v693_v14 = vmul.f32 %v2062_v61, %v677_v10  ;;  %v758_v60 = vmul.f32 %v2033_v57, %v742_v56  ;;  %v884_v34 = vadd.f32 1.0, %v868_v48  ;;  %1452 = vmatprep.subr.bf16.mxu1 %v1526_v16 }
 0x25c   :  { %v851_v52 = vsub.f32 1.0, %v835_v7  ;;  %v484_v57 = vmul.f32 0.5, %v1914_v8  ;;  %v483_v3 = vmul.f32 0.5, %v1925_v21  ;;  %v534_v35 = vsel %vm518_vm15, 1.0, %v1527_v62 }
 0x25d   :  { %v709_v36 = vadd.f32 -0.28449672, %v693_v14  ;;  %1427 = vmatpush3.bf16.msra.mxu0 %v1426_v15  ;;  %v838_v32 = vmul.f32 %v1523_v29, %v758_v60  ;;  %vm517_vm0 = vcmp.ge.f32.partialorder %v1985_v39, 0.0  ;;  %v486_v59 = vmul.f32 0.5, %v1929_v5  ;;  %v903_v39 = vld [vmem:[%s2129_s4] sm:$0xff] }
 0x25e   :  { %1428 = vmatprep.subr.bf16.mxu0 %v1526_v16  ;;  %v867_v23 = vmul.f32 %v851_v52, %v531_v47  ;;  %1454 = vmatpush3.bf16.msra.mxu1 %v1453_v30  ;;  %v900_v37 = vmul.f32 %v884_v34, %v484_v57  ;;  %v533_v21 = vsel %vm517_vm0, 1.0, %v1527_v62  ;;  %v485_v42 = vmul.f32 0.5, %v1976_v26 }
 0x25f   :  { %v725_v53 = vmul.f32 %v2062_v61, %v709_v36  ;;  %v854_v11 = vsub.f32 1.0, %v838_v32  ;;  %1455 = vmatprep.subr.bf16.mxu1 %v1526_v16 }
 0x260   :  { %v883_v41 = vadd.f32 1.0, %v867_v23 }
 0x261   :  { %v741_v54 = vadd.f32 0.2548296, %v725_v53  ;;  %v870_v19 = vmul.f32 %v854_v11, %v534_v35 }
 0x262   :  { %v899_v50 = vmul.f32 %v883_v41, %v483_v3  ;;  %v1525_v33 = vpop.eup %1524  ;;  %1457 = vmatpush3.bf16.msra.mxu1 %v1456_v27 }
 0x263   :  { %v757_v8 = vmul.f32 %v2062_v61, %v741_v54  ;;  %v886_v4 = vadd.f32 1.0, %v870_v19 }
 0x264   :  { %v1429_v13 = vpack.c.bf16 %v900_v37, %v899_v50 }
 0x265   :  { %v837_v44 = vmul.f32 %v1525_v33, %v757_v8  ;;  %v902_v22 = vmul.f32 %v886_v4, %v486_v59 }
 0x266   :  { %1430 = vmatpush3.bf16.msra.mxu0 %v1429_v13 }
 0x267   :  { %v853_v25 = vsub.f32 1.0, %v837_v44  ;;  %1431 = vmatprep.subr.bf16.mxu0 %v1526_v16 }
 0x269   :  { %v869_v17 = vmul.f32 %v853_v25, %v533_v21 }
 0x26b   :  { %v885_v61 = vadd.f32 1.0, %v869_v17 }
 0x26d   :  { %v901_v6 = vmul.f32 %v885_v61, %v485_v42 }
 0x26f   :  { %v1432_v1 = vpack.c.bf16 %v902_v22, %v901_v6 }
 0x271   :  { %1433 = vmatpush3.bf16.msra.mxu0 %v1432_v1 }
 0x274   :  { %1309 = vmatmul.mubr.f32.vlgmr.msra.gmra.mrb[16].mxu0 %v903_v39 }
 0x347   :  { %v970_v40 = vpop.f32.mrb[16].mxu0 }
 0x348   :  { %v1310_v12 = vpop.f32.mrb[17].mxu0  ;;  %1344 = vmatmul.mubr.f32.vlgmr.msra.gmra.mrb[16].mxu1 %v970_v40 }
 0x41b   :  { %v1056_v62 = vpop.f32.mrb[16].mxu1 }
 0x41c   :  { %1060 = vst [vmem:[%s2130_s6] sm:$0xff] %v1056_v62  ;;  %v1345_v16 = vpop.f32.mrb[17].mxu1 }

</bundles_post_ra>
